<compile_context>
chip_gen: v7x
topology: tpu7x:2x2x1
jax: 0.10.0
libtpu: 0.0.40
codegen_flags: <defaults>
</compile_context>

<pallas_src>
import functools

import numpy as np
import jax
import jax.numpy as jnp
from jax.experimental import pallas as pl
from jax.experimental.pallas import tpu as pltpu

_INV_SQRT2 = float(1.0 / np.sqrt(2.0))


def _gelu(x, approximate=False):
    if approximate:
        # tanh approximation (EUP slot, cheaper on v5e) -- numerics differ
        # slightly from nn.GELU()'s exact-erf default, so it is opt-in only.
        c = float(np.sqrt(2.0 / np.pi))
        return 0.5 * x * (1.0 + jnp.tanh(c * (x + 0.044715 * x * x * x)))
    return 0.5 * x * (1.0 + jax.lax.erf(x * _INV_SQRT2))


# --------------------------------------------------------------------------
# Kernels
# --------------------------------------------------------------------------
def _gcn_kernel_slab(x_ref, adj_ref, wt_ref, bias_ref, o_ref, h_scr=None, *,
                     approx_gelu=False):
    """Lane-slab path for F_out < 128.

    x_ref   : (Bt, Np, F_in)     bf16
    adj_ref : (Np, Np)           bf16  (batch-invariant, normalized adjacency)
    wt_ref  : (F_in, F_out)      bf16  (batch-invariant, pre-transposed weight)
    bias_ref: (1, Bt*F_out)      f32   (batch-invariant, bias tiled Bt times)
    o_ref   : (1, Np, Bt*F_out)  bf16  (lane-dense output slab)
    h_scr   : (Np, Bt*F_out)     bf16  VMEM scratch (None on fallback path)
    """
    bt, n, f_in = x_ref.shape
    f_out = wt_ref.shape[1]

    # Linear for all Bt graphs in ONE MXU matmul (M = Bt*Np rows).
    # Leading-dim collapse only; cheap because Np % 16 == 0 (bf16 packing).
    x2 = x_ref[...].reshape(bt * n, f_in)
    h = jnp.dot(x2, wt_ref[...], preferred_element_type=jnp.float32)

    if h_scr is not None:
        # Scatter per-graph h-blocks into the lane slab via a VMEM scratch
        # (single live bf16 copy of H, no value-level concat relayout).
        for b in range(bt):
            h_scr[:, b * f_out:(b + 1) * f_out] = (
                h[b * n:(b + 1) * n, :].astype(jnp.bfloat16))
        big_h = h_scr[...]
    else:
        # Portable fallback: build the slab as a value.
        big_h = jnp.concatenate(
            [h[b * n:(b + 1) * n, :].astype(jnp.bfloat16) for b in range(bt)],
            axis=-1)

    # Propagation: one wide MXU matmul, f32 accumulation, lane-dense store.
    out = jnp.dot(adj_ref[...], big_h, preferred_element_type=jnp.float32)
    out = _gelu(out + bias_ref[...], approx_gelu)
    o_ref[0] = out.astype(o_ref.dtype)


def _gcn_kernel_direct(x_ref, adj_ref, wt_ref, bias_ref, o_ref, *,
                       approx_gelu=False):
    """Direct path for F_out >= 128 (per-graph output already lane-dense)."""
    bt, n, f_in = x_ref.shape
    x2 = x_ref[...].reshape(bt * n, f_in)
    h = jnp.dot(x2, wt_ref[...], preferred_element_type=jnp.float32)
    hb = h.astype(jnp.bfloat16)
    adj = adj_ref[...]
    bias = bias_ref[...]
    for b in range(bt):
        out = jnp.dot(adj, hb[b * n:(b + 1) * n, :],
                      preferred_element_type=jnp.float32)
        o_ref[b] = _gelu(out + bias, approx_gelu).astype(o_ref.dtype)


# --------------------------------------------------------------------------
# Tiling / VMEM budgeting
# --------------------------------------------------------------------------
def _tile_vmem_bytes(bt, n_pad, f_in, f_out, slab):
    """Conservative per-step VMEM footprint (with pipeline buffers)."""
    x_tile = 2 * bt * n_pad * f_in * 2              # bf16 input, double-buffered
    adj = n_pad * n_pad * 2                         # bf16, batch-invariant
    wt = f_in * f_out * 2                           # bf16, batch-invariant
    bias = (bt if slab else 1) * f_out * 4          # f32, batch-invariant
    out = 2 * bt * n_pad * f_out * 2                # bf16 output, double-buffered
    h_f32 = bt * n_pad * f_out * 4                  # f32 intermediate
    scr = (bt * n_pad * f_out * 2) if slab else 0   # bf16 slab scratch
    return x_tile + adj + wt + bias + out + h_f32 + scr


def _choose_batch_tile(B, n_pad, f_in, f_out, budget_bytes, slab):
    """Largest divisor Bt of B that (a) leaves >= 2 grid steps when B >= 2
    (so the 'parallel' batch axis can shard across v7x's two TensorCores),
    (b) fits the VMEM budget, preferring lane-dense outputs
    (Bt*F_out a multiple of 128, else >= 128 lanes)."""
    cap = max(1, B // 2) if B >= 2 else B
    cands = [d for d in range(1, cap + 1)
             if B % d == 0
             and _tile_vmem_bytes(d, n_pad, f_in, f_out, slab) <= budget_bytes]
    if not cands:
        return 1  # NOTE: prime/odd B or tiny budgets fall back to Bt=1.

    def score(bt):
        lanes = bt * f_out
        return (lanes % 128 == 0, lanes >= 128, bt)

    return max(cands, key=score)


# --------------------------------------------------------------------------
# Wrapper
# --------------------------------------------------------------------------
def gcn_layer_forward(x, skeleton, weight, bias, *, approximate_gelu=False):
    """x: [B, N, F_in], skeleton: [N, N], weight: [F_out, F_in], bias: [F_out]."""
    B, N, F_in = x.shape
    F_out = weight.shape[0]

    # ---- Hoisted, batch-invariant preprocessing (computed ONCE). ----
    idx = jnp.arange(N)
    adj = skeleton.astype(jnp.float32).at[idx, idx].set(1.0)   # self-loops
    deg = jnp.maximum(jnp.sum(adj, axis=-1), 1.0)              # clamp(deg, min=1)
    d = jax.lax.rsqrt(deg)
    adj_norm = (d[:, None] * adj * d[None, :]).astype(jnp.bfloat16)
    wt = weight.T.astype(jnp.bfloat16)                         # (F_in, F_out)

    # Pad node axis to a multiple of 16 (bf16 sublane packing) so the in-kernel
    # leading-dim collapse is layout-free. Padded rows/cols are zero.
    Np = -(-N // 16) * 16
    if Np != N:
        x_pad = jnp.pad(x, ((0, 0), (0, Np - N), (0, 0)))
        adj_norm = jnp.pad(adj_norm, ((0, Np - N), (0, Np - N)))
    else:
        x_pad = x
    x_bf = x_pad.astype(jnp.bfloat16)

    # ---- Generation-aware VMEM budgeting. ----
    try:
        vmem_cap = int(pltpu.get_tpu_info().vmem_capacity_bytes)
    except Exception:
        vmem_cap = 64 * 1024 * 1024  # conservative (v7x per-core physical)
    budget = min(vmem_cap // 2, 28 * 1024 * 1024)

    slab = F_out < 128
    Bt = _choose_batch_tile(B, Np, F_in, F_out, budget, slab)
    G = B // Bt
    tile_bytes = _tile_vmem_bytes(Bt, Np, F_in, F_out, slab)
    vmem_limit = int(min(max(vmem_cap - (4 << 20), 8 << 20),
                         max(4 * tile_bytes, 16 << 20)))

    compiler_params = pltpu.CompilerParams(
        dimension_semantics=("parallel",),
        vmem_limit_bytes=vmem_limit)

    def build(prefer):
        # prefer=True : Buffered(1) on batch-invariant blocks + scratch-built slab.
        # prefer=False: portable fallback (default buffering, value-level slab).
        pm = {"pipeline_mode": pl.Buffered(1)} if prefer else {}
        if slab:
            kern = functools.partial(_gcn_kernel_slab,
                                     approx_gelu=approximate_gelu)
            in_specs = [
                pl.BlockSpec((Bt, Np, F_in), lambda g: (g, 0, 0)),
                pl.BlockSpec((Np, Np), lambda g: (0, 0), **pm),
                pl.BlockSpec((F_in, F_out), lambda g: (0, 0), **pm),
                pl.BlockSpec((1, Bt * F_out), lambda g: (0, 0), **pm),
            ]
            out_specs = pl.BlockSpec((1, Np, Bt * F_out), lambda g: (g, 0, 0))
            out_shape = jax.ShapeDtypeStruct((G, Np, Bt * F_out), jnp.bfloat16)
            scratch = ([pltpu.VMEM((Np, Bt * F_out), jnp.bfloat16)]
                       if prefer else [])
        else:
            kern = functools.partial(_gcn_kernel_direct,
                                     approx_gelu=approximate_gelu)
            in_specs = [
                pl.BlockSpec((Bt, Np, F_in), lambda g: (g, 0, 0)),
                pl.BlockSpec((Np, Np), lambda g: (0, 0), **pm),
                pl.BlockSpec((F_in, F_out), lambda g: (0, 0), **pm),
                pl.BlockSpec((1, F_out), lambda g: (0, 0), **pm),
            ]
            out_specs = pl.BlockSpec((Bt, Np, F_out), lambda g: (g, 0, 0))
            out_shape = jax.ShapeDtypeStruct((B, Np, F_out), jnp.bfloat16)
            scratch = []
        return pl.pallas_call(
            kern,
            out_shape=out_shape,
            grid_spec=pltpu.PrefetchScalarGridSpec(
                num_scalar_prefetch=0,
                grid=(G,),
                in_specs=in_specs,
                out_specs=out_specs,
                scratch_shapes=scratch),
            compiler_params=compiler_params)

    bias_f32 = bias.astype(jnp.float32)
    bias_in = jnp.tile(bias_f32, Bt)[None, :] if slab else bias_f32[None, :]

    try:
        out = build(True)(x_bf, adj_norm, wt, bias_in)
    except Exception:
        # Portability fallback (e.g. pipeline_mode / lane-slice store rejected).
        out = build(False)(x_bf, adj_norm, wt, bias_in)

    if slab:
        # Layout plumbing back to [B, Np, F_out] (only on the F_out<128 path).
        out = out.reshape(G, Np, Bt, F_out)
        out = jnp.transpose(out, (0, 2, 1, 3)).reshape(B, Np, F_out)
    out = out[:, :N, :]

    # TODO(synk): Dropout is identity here (eval mode); training-mode dropout
    # would use pltpu.prng_seed / pltpu.prng_random_bits for the mask.
    return out.astype(x.dtype)


# --------------------------------------------------------------------------
# Plain-JAX reference (same bf16-operand / f32-accumulation recipe)
# --------------------------------------------------------------------------
def _reference(x, skeleton, weight, bias):
    N = skeleton.shape[0]
    idx = jnp.arange(N)
    adj = skeleton.astype(jnp.float32).at[idx, idx].set(1.0)
    deg = jnp.maximum(adj.sum(-1), 1.0)
    d = jax.lax.rsqrt(deg)
    adj_norm = (d[:, None] * adj * d[None, :]).astype(jnp.bfloat16)

    wt = weight.T.astype(jnp.bfloat16)
    h = jnp.einsum("bnf,fo->bno", x.astype(jnp.bfloat16), wt,
                   preferred_element_type=jnp.float32).astype(jnp.bfloat16)
    out = jnp.einsum("ij,bjf->bif", adj_norm, h,
                     preferred_element_type=jnp.float32) + bias.astype(jnp.float32)
    out = 0.5 * out * (1.0 + jax.lax.erf(out * _INV_SQRT2))
    # Kernel writes bf16 to HBM; match the final rounding.
    return out.astype(jnp.bfloat16).astype(jnp.float32)


if __name__ == "__main__":
    # B=8 so the batch-tile heuristic picks Bt=4 -> 128-lane output slab and
    # G=2 grid steps (v7x dual-TC shardable).
    B, N, F_in, F_out = 8, 16, 32, 32

    key = jax.random.PRNGKey(0)
    kx, kadj, kw = jax.random.split(key, 3)

    # Node features.
    x = jax.random.normal(kx, (B, N, F_in), dtype=jnp.float32)

    # Skeleton adjacency: symmetric 0/1 matrix (undirected), no self loops.
    a = (jax.random.uniform(kadj, (N, N)) < 0.3).astype(jnp.float32)
    skeleton = jnp.triu(a, k=1)
    skeleton = skeleton + skeleton.T

    # Parameters: glorot-uniform weight (torch_geometric default), zero bias.
    limit = np.sqrt(6.0 / (F_in + F_out))
    weight = jax.random.uniform(kw, (F_out, F_in), minval=-limit, maxval=limit,
                                dtype=jnp.float32)
    bias = jnp.zeros((F_out,), dtype=jnp.float32)

    y = gcn_layer_forward(x, skeleton, weight, bias)
    y = jax.block_until_ready(y)

    y_ref = _reference(x, skeleton, weight, bias)
    # bf16 matmul operands / f32 accumulation / bf16 output store in both
    # kernel and reference; tolerance covers erf & accumulation-order ULPs.
    np.testing.assert_allclose(np.asarray(y), np.asarray(y_ref),
                               rtol=1e-2, atol=1e-2)

    print("KERNEL_OK")
</pallas_src>

<mosaic_0001>
module attributes {stable_mosaic.version = 11 : i64} {
  func.func @_gcn_kernel_slab(%arg0: i32, %arg1: memref<4x16x32xbf16, #tpu.memory_space<vmem>>, %arg2: memref<16x16xbf16, #tpu.memory_space<vmem>>, %arg3: memref<32x32xbf16, #tpu.memory_space<vmem>>, %arg4: memref<1x128xf32, #tpu.memory_space<vmem>>, %arg5: memref<1x16x128xbf16, #tpu.memory_space<vmem>>, %arg6: memref<16x128xbf16, #tpu.memory_space<vmem>>) attributes {dimension_semantics = [#tpu.dimension_semantics<parallel>], iteration_bounds = array<i64: 2>, scalar_prefetch = 0 : i64, scratch_operands = 1 : i64, tpu.core_type = #tpu.core_type<tc>, window_params = [{transform_indices = @transform_0, window_bounds = array<i64: 4, 16, 32>}, {pipeline_mode = #tpu.pipeline_mode<synchronous>, transform_indices = @transform_1, window_bounds = array<i64: 16, 16>}, {pipeline_mode = #tpu.pipeline_mode<synchronous>, transform_indices = @transform_2, window_bounds = array<i64: 32, 32>}, {pipeline_mode = #tpu.pipeline_mode<synchronous>, transform_indices = @transform_3, window_bounds = array<i64: 1, 128>}, {transform_indices = @transform_4, window_bounds = array<i64: 1, 16, 128>}]} {
    %c0 = arith.constant 0 : index
    %c0_0 = arith.constant 0 : index
    %c0_1 = arith.constant 0 : index
    %0 = vector.load %arg1[%c0, %c0_0, %c0_1] : memref<4x16x32xbf16, #tpu.memory_space<vmem>>, vector<4x16x32xbf16>
    %1 = vector.shape_cast %0 : vector<4x16x32xbf16> to vector<64x32xbf16>
    %c0_2 = arith.constant 0 : index
    %c0_3 = arith.constant 0 : index
    %2 = vector.load %arg3[%c0_2, %c0_3] : memref<32x32xbf16, #tpu.memory_space<vmem>>, vector<32x32xbf16>
    %cst = arith.constant dense<0.000000e+00> : vector<64x32xf32>
    %3 = tpu.matmul %1, %2, %cst {dimension_numbers = #tpu.dot_dimension_numbers<[1], [0], [0], [1], [0, 0, 1, 1], [], []>} : vector<64x32xbf16>, vector<32x32xbf16>, vector<64x32xf32> -> vector<64x32xf32>
    %4 = vector.extract_strided_slice %3 {offsets = [0, 0], sizes = [16, 32], strides = [1, 1]} : vector<64x32xf32> to vector<16x32xf32>
    %5 = arith.truncf %4 : vector<16x32xf32> to vector<16x32xbf16>
    %c0_4 = arith.constant 0 : index
    %c0_5 = arith.constant 0 : index
    %6 = vector.load %arg6[%c0_4, %c0_5] : memref<16x128xbf16, #tpu.memory_space<vmem>>, vector<16x32xbf16>
    tpu.vector_store %arg6[%c0_4, %c0_5], %5 {strides = array<i32>} : memref<16x128xbf16, #tpu.memory_space<vmem>>, vector<16x32xbf16>,
    %7 = vector.extract_strided_slice %3 {offsets = [16, 0], sizes = [16, 32], strides = [1, 1]} : vector<64x32xf32> to vector<16x32xf32>
    %8 = arith.truncf %7 : vector<16x32xf32> to vector<16x32xbf16>
    %c0_6 = arith.constant 0 : index
    %c32 = arith.constant 32 : index
    %9 = vector.load %arg6[%c0_6, %c32] : memref<16x128xbf16, #tpu.memory_space<vmem>>, vector<16x32xbf16>
    tpu.vector_store %arg6[%c0_6, %c32], %8 {strides = array<i32>} : memref<16x128xbf16, #tpu.memory_space<vmem>>, vector<16x32xbf16>,
    %10 = vector.extract_strided_slice %3 {offsets = [32, 0], sizes = [16, 32], strides = [1, 1]} : vector<64x32xf32> to vector<16x32xf32>
    %11 = arith.truncf %10 : vector<16x32xf32> to vector<16x32xbf16>
    %c0_7 = arith.constant 0 : index
    %c64 = arith.constant 64 : index
    %12 = vector.load %arg6[%c0_7, %c64] : memref<16x128xbf16, #tpu.memory_space<vmem>>, vector<16x32xbf16>
    tpu.vector_store %arg6[%c0_7, %c64], %11 {strides = array<i32>} : memref<16x128xbf16, #tpu.memory_space<vmem>>, vector<16x32xbf16>,
    %13 = vector.extract_strided_slice %3 {offsets = [48, 0], sizes = [16, 32], strides = [1, 1]} : vector<64x32xf32> to vector<16x32xf32>
    %14 = arith.truncf %13 : vector<16x32xf32> to vector<16x32xbf16>
    %c0_8 = arith.constant 0 : index
    %c96 = arith.constant 96 : index
    %15 = vector.load %arg6[%c0_8, %c96] : memref<16x128xbf16, #tpu.memory_space<vmem>>, vector<16x32xbf16>
    tpu.vector_store %arg6[%c0_8, %c96], %14 {strides = array<i32>} : memref<16x128xbf16, #tpu.memory_space<vmem>>, vector<16x32xbf16>,
    %c0_9 = arith.constant 0 : index
    %c0_10 = arith.constant 0 : index
    %16 = vector.load %arg6[%c0_9, %c0_10] : memref<16x128xbf16, #tpu.memory_space<vmem>>, vector<16x128xbf16>
    %c0_11 = arith.constant 0 : index
    %c0_12 = arith.constant 0 : index
    %17 = vector.load %arg2[%c0_11, %c0_12] : memref<16x16xbf16, #tpu.memory_space<vmem>>, vector<16x16xbf16>
    %cst_13 = arith.constant dense<0.000000e+00> : vector<16x128xf32>
    %18 = tpu.matmul %17, %16, %cst_13 {dimension_numbers = #tpu.dot_dimension_numbers<[1], [0], [0], [1], [0, 0, 1, 1], [], []>} : vector<16x16xbf16>, vector<16x128xbf16>, vector<16x128xf32> -> vector<16x128xf32>
    %c0_14 = arith.constant 0 : index
    %c0_15 = arith.constant 0 : index
    %19 = vector.load %arg4[%c0_14, %c0_15] : memref<1x128xf32, #tpu.memory_space<vmem>>, vector<1x128xf32>
    %20 = vector.broadcast %19 : vector<1x128xf32> to vector<16x128xf32>
    %21 = arith.addf %18, %20 : vector<16x128xf32>
    %cst_16 = arith.constant 5.000000e-01 : f32
    %22 = vector.broadcast %cst_16 : f32 to vector<16x128xf32>
    %23 = arith.mulf %22, %21 : vector<16x128xf32>
    %cst_17 = arith.constant 0.707106769 : f32
    %24 = vector.broadcast %cst_17 : f32 to vector<16x128xf32>
    %25 = arith.mulf %21, %24 : vector<16x128xf32>
    %26 = math.erf %25 : vector<16x128xf32>
    %cst_18 = arith.constant 1.000000e+00 : f32
    %27 = vector.broadcast %cst_18 : f32 to vector<16x128xf32>
    %28 = arith.addf %27, %26 : vector<16x128xf32>
    %29 = arith.mulf %23, %28 : vector<16x128xf32>
    %30 = arith.truncf %29 : vector<16x128xf32> to vector<16x128xbf16>
    %c0_19 = arith.constant 0 : index
    %c0_20 = arith.constant 0 : index
    %c0_21 = arith.constant 0 : index
    %31 = vector.load %arg5[%c0_19, %c0_20, %c0_21] : memref<1x16x128xbf16, #tpu.memory_space<vmem>>, vector<1x16x128xbf16>
    %32 = vector.shape_cast %31 : vector<1x16x128xbf16> to vector<16x128xbf16>
    %33 = vector.shape_cast %30 : vector<16x128xbf16> to vector<1x16x128xbf16>
    tpu.vector_store %arg5[%c0_19, %c0_20, %c0_21], %33 {strides = array<i32>} : memref<1x16x128xbf16, #tpu.memory_space<vmem>>, vector<1x16x128xbf16>,
    return
  }
  func.func @transform_0(%arg0: i32) -> (i32, i32, i32) {
    %c0_i32 = arith.constant 0 : i32
    %c0_i32_0 = arith.constant 0 : i32
    %c0_i32_1 = arith.constant 0 : i32
    return %arg0, %c0_i32, %c0_i32_0 : i32, i32, i32
  }
  func.func @transform_1(%arg0: i32) -> (i32, i32) {
    %c0_i32 = arith.constant 0 : i32
    %c0_i32_0 = arith.constant 0 : i32
    %c0_i32_1 = arith.constant 0 : i32
    return %c0_i32, %c0_i32_0 : i32, i32
  }
  func.func @transform_2(%arg0: i32) -> (i32, i32) {
    %c0_i32 = arith.constant 0 : i32
    %c0_i32_0 = arith.constant 0 : i32
    %c0_i32_1 = arith.constant 0 : i32
    return %c0_i32, %c0_i32_0 : i32, i32
  }
  func.func @transform_3(%arg0: i32) -> (i32, i32) {
    %c0_i32 = arith.constant 0 : i32
    %c0_i32_0 = arith.constant 0 : i32
    %c0_i32_1 = arith.constant 0 : i32
    return %c0_i32, %c0_i32_0 : i32, i32
  }
  func.func @transform_4(%arg0: i32) -> (i32, i32, i32) {
    %c0_i32 = arith.constant 0 : i32
    %c0_i32_0 = arith.constant 0 : i32
    %c0_i32_1 = arith.constant 0 : i32
    return %arg0, %c0_i32, %c0_i32_0 : i32, i32, i32
  }
}

module attributes {stable_mosaic.version = 11 : i64} {
  func.func @_gcn_kernel_slab(%arg0: i32, %arg1: memref<4x16x32xbf16, #tpu.memory_space<vmem>>, %arg2: memref<16x16xbf16, #tpu.memory_space<vmem>>, %arg3: memref<32x32xbf16, #tpu.memory_space<vmem>>, %arg4: memref<1x128xf32, #tpu.memory_space<vmem>>, %arg5: memref<1x16x128xbf16, #tpu.memory_space<vmem>>) attributes {dimension_semantics = [#tpu.dimension_semantics<parallel>], iteration_bounds = array<i64: 2>, scalar_prefetch = 0 : i64, scratch_operands = 0 : i64, tpu.core_type = #tpu.core_type<tc>, window_params = [{transform_indices = @transform_0, window_bounds = array<i64: 4, 16, 32>}, {pipeline_mode = #tpu.pipeline_mode<synchronous>, transform_indices = @transform_1, window_bounds = array<i64: 16, 16>}, {pipeline_mode = #tpu.pipeline_mode<synchronous>, transform_indices = @transform_2, window_bounds = array<i64: 32, 32>}, {pipeline_mode = #tpu.pipeline_mode<synchronous>, transform_indices = @transform_3, window_bounds = array<i64: 1, 128>}, {transform_indices = @transform_4, window_bounds = array<i64: 1, 16, 128>}]} {
    %c0 = arith.constant 0 : index
    %c0_0 = arith.constant 0 : index
    %c0_1 = arith.constant 0 : index
    %0 = vector.load %arg1[%c0, %c0_0, %c0_1] : memref<4x16x32xbf16, #tpu.memory_space<vmem>>, vector<4x16x32xbf16>
    %1 = vector.shape_cast %0 : vector<4x16x32xbf16> to vector<64x32xbf16>
    %c0_2 = arith.constant 0 : index
    %c0_3 = arith.constant 0 : index
    %2 = vector.load %arg3[%c0_2, %c0_3] : memref<32x32xbf16, #tpu.memory_space<vmem>>, vector<32x32xbf16>
    %cst = arith.constant dense<0.000000e+00> : vector<64x32xf32>
    %3 = tpu.matmul %1, %2, %cst {dimension_numbers = #tpu.dot_dimension_numbers<[1], [0], [0], [1], [0, 0, 1, 1], [], []>} : vector<64x32xbf16>, vector<32x32xbf16>, vector<64x32xf32> -> vector<64x32xf32>
    %4 = vector.extract_strided_slice %3 {offsets = [0, 0], sizes = [16, 32], strides = [1, 1]} : vector<64x32xf32> to vector<16x32xf32>
    %5 = arith.truncf %4 : vector<16x32xf32> to vector<16x32xbf16>
    %6 = vector.extract_strided_slice %3 {offsets = [16, 0], sizes = [16, 32], strides = [1, 1]} : vector<64x32xf32> to vector<16x32xf32>
    %7 = arith.truncf %6 : vector<16x32xf32> to vector<16x32xbf16>
    %8 = vector.extract_strided_slice %3 {offsets = [32, 0], sizes = [16, 32], strides = [1, 1]} : vector<64x32xf32> to vector<16x32xf32>
    %9 = arith.truncf %8 : vector<16x32xf32> to vector<16x32xbf16>
    %10 = vector.extract_strided_slice %3 {offsets = [48, 0], sizes = [16, 32], strides = [1, 1]} : vector<64x32xf32> to vector<16x32xf32>
    %11 = arith.truncf %10 : vector<16x32xf32> to vector<16x32xbf16>
    %12 = tpu.concatenate %5, %7, %9, %11 in 1 : vector<16x32xbf16>, vector<16x32xbf16>, vector<16x32xbf16>, vector<16x32xbf16> -> vector<16x128xbf16>
    %c0_4 = arith.constant 0 : index
    %c0_5 = arith.constant 0 : index
    %13 = vector.load %arg2[%c0_4, %c0_5] : memref<16x16xbf16, #tpu.memory_space<vmem>>, vector<16x16xbf16>
    %cst_6 = arith.constant dense<0.000000e+00> : vector<16x128xf32>
    %14 = tpu.matmul %13, %12, %cst_6 {dimension_numbers = #tpu.dot_dimension_numbers<[1], [0], [0], [1], [0, 0, 1, 1], [], []>} : vector<16x16xbf16>, vector<16x128xbf16>, vector<16x128xf32> -> vector<16x128xf32>
    %c0_7 = arith.constant 0 : index
    %c0_8 = arith.constant 0 : index
    %15 = vector.load %arg4[%c0_7, %c0_8] : memref<1x128xf32, #tpu.memory_space<vmem>>, vector<1x128xf32>
    %16 = vector.broadcast %15 : vector<1x128xf32> to vector<16x128xf32>
    %17 = arith.addf %14, %16 : vector<16x128xf32>
    %cst_9 = arith.constant 5.000000e-01 : f32
    %18 = vector.broadcast %cst_9 : f32 to vector<16x128xf32>
    %19 = arith.mulf %18, %17 : vector<16x128xf32>
    %cst_10 = arith.constant 0.707106769 : f32
    %20 = vector.broadcast %cst_10 : f32 to vector<16x128xf32>
    %21 = arith.mulf %17, %20 : vector<16x128xf32>
    %22 = math.erf %21 : vector<16x128xf32>
    %cst_11 = arith.constant 1.000000e+00 : f32
    %23 = vector.broadcast %cst_11 : f32 to vector<16x128xf32>
    %24 = arith.addf %23, %22 : vector<16x128xf32>
    %25 = arith.mulf %19, %24 : vector<16x128xf32>
    %26 = arith.truncf %25 : vector<16x128xf32> to vector<16x128xbf16>
    %c0_12 = arith.constant 0 : index
    %c0_13 = arith.constant 0 : index
    %c0_14 = arith.constant 0 : index
    %27 = vector.load %arg5[%c0_12, %c0_13, %c0_14] : memref<1x16x128xbf16, #tpu.memory_space<vmem>>, vector<1x16x128xbf16>
    %28 = vector.shape_cast %27 : vector<1x16x128xbf16> to vector<16x128xbf16>
    %29 = vector.shape_cast %26 : vector<16x128xbf16> to vector<1x16x128xbf16>
    tpu.vector_store %arg5[%c0_12, %c0_13, %c0_14], %29 {strides = array<i32>} : memref<1x16x128xbf16, #tpu.memory_space<vmem>>, vector<1x16x128xbf16>,
    return
  }
  func.func @transform_0(%arg0: i32) -> (i32, i32, i32) {
    %c0_i32 = arith.constant 0 : i32
    %c0_i32_0 = arith.constant 0 : i32
    %c0_i32_1 = arith.constant 0 : i32
    return %arg0, %c0_i32, %c0_i32_0 : i32, i32, i32
  }
  func.func @transform_1(%arg0: i32) -> (i32, i32) {
    %c0_i32 = arith.constant 0 : i32
    %c0_i32_0 = arith.constant 0 : i32
    %c0_i32_1 = arith.constant 0 : i32
    return %c0_i32, %c0_i32_0 : i32, i32
  }
  func.func @transform_2(%arg0: i32) -> (i32, i32) {
    %c0_i32 = arith.constant 0 : i32
    %c0_i32_0 = arith.constant 0 : i32
    %c0_i32_1 = arith.constant 0 : i32
    return %c0_i32, %c0_i32_0 : i32, i32
  }
  func.func @transform_3(%arg0: i32) -> (i32, i32) {
    %c0_i32 = arith.constant 0 : i32
    %c0_i32_0 = arith.constant 0 : i32
    %c0_i32_1 = arith.constant 0 : i32
    return %c0_i32, %c0_i32_0 : i32, i32
  }
  func.func @transform_4(%arg0: i32) -> (i32, i32, i32) {
    %c0_i32 = arith.constant 0 : i32
    %c0_i32_0 = arith.constant 0 : i32
    %c0_i32_1 = arith.constant 0 : i32
    return %arg0, %c0_i32, %c0_i32_0 : i32, i32, i32
  }
}

</mosaic_0001>

<bundles_post_ra>
// kernel: tpu_custom_call.1
= control target key start
LH: loop header
LB: loop body
LE: loop exit
PB: predicated region body
PF: predicated region fallthrough
CT: control target
= control target key end

     0   :  { %9 = vsyncpa [#allocation4], 0  ;;  %s1185_s0 = inlined_call_operand.hbm [shape: bf16[8,16,32], index: 0, kind: input, shape index: {}]   ;;  %s1186_s1 = inlined_call_operand.hbm [shape: bf16[16,16], index: 1, kind: input, shape index: {}]   ;;  %s1187_s2 = inlined_call_operand.hbm [shape: bf16[32,32], index: 2, kind: input, shape index: {}]   ;;  %s1188_s3 = inlined_call_operand.vmem [shape: f32[1,128], index: 3, kind: input, shape index: {}]   ;;  %s1189_s4 = inlined_call_operand.hbm [shape: bf16[2,16,128], index: 4, kind: output, shape index: {}]  }
   0x1   :  { %11 = vsyncpa [#allocation4 + $0x1], 0 }
   0x2   :  { %12 = vsyncpa [#allocation7], 0 }
   0x3   :  { %13 = vsyncpa [#allocation5], 0 }
   0x4   :  { %15 = vsyncpa [#allocation5 + $0x1], 0  ;;  %s930_s15 = smov 0   ;;  %s932_s16 = smov 0  }
   0x5   :  { %s934_s17 = smov 0   ;;  %s936_s18 = smov 0  }
   0x6 LB: > { %s951_s19 = sadd.s32 4294967295, %s891_s18   ;;  %s579_s20 = sadd.s32 4294967294, %s891_s18   ;;  %s891_s18 = sphi %s936_s18, %s1209_s18   ;;  %s887_s17 = sphi %s934_s17, %s1208_s17   ;;  %s883_s16 = sphi %s932_s16, %s1207_s16   ;;  %s879_s15 = sphi %s930_s15, %s1206_s15  }
   0x7   : > { %p41_p0 = scmp.ne.s32.totalorder %s883_s16, %s879_s15  ;;  %p1190_p1 = scmp.eq.s32.totalorder %s951_s19, 0 }
   0x8   : > { %p134_p3 = scmp.eq.s32.totalorder %s579_s20, 1  ;;  %p580_p5 = scmp.ge.s32.totalorder %s891_s18, 1 }
   0x9   : > { %p960_p4 = por %p1190_p1, %p41_p0  ;;  %p141_p7 = scmp.lt.s32.totalorder %s891_s18, 3 }
   0xa   : > { %p965_p6 = por %p134_p3, %p41_p0  ;;  %s893_s24 = smov [#allocation6]  }
   0xb   : > { %s1193_s21 = scalar_select %p960_p4, 1, 0 }
   0xc   : > { %s1194_s22 = scalar_select %p965_p6, 1, 0 }
   0xd   : > { %p970_p8 = pnand %p580_p5, %p141_p7  ;;  %s153_s25 = sshll.u32 %s893_s24, 4  ;;  %s974_s25 = int_to_ptr.vmem [resolvable:$true] %s153_s25 }
   0xe   : > { %s894_s27 = smov [#allocation8]   ;;  %s735_s5 = scalar_lea.hbm %s1186_s1, 128 }
   0xf   : > { %p661_p9 = pneg %p970_p8  ;;  %s166_s28 = sshll.u32 %s894_s27, 4  ;;  %s985_s28 = int_to_ptr.vmem [resolvable:$true] %s166_s28 }
  0x10   : > { %p736_p12 = scmp.ne.s32.totalorder %s1186_s1, %s735_s5  ;;  %p742_p5 = scmp.lt.u32.totalorder %s735_s5, %s1186_s1 }
  0x11   : > { %p981_p11 = pnand %p661_p9, %p1190_p1 }
  0x13   : > { %p737_p13 = pneg %p981_p11 }
  0x15   : > { %p738_p0 = pnand %p737_p13, %p736_p12 }
  0x17   : > { %p739_p3 = pneg %p738_p0 }
  0x19   : > { %p744_p7 = pnand %p742_p5, %p739_p3 }
  0x1b   : > { %747 = shalt.err (!%p744_p7)
}
  0x1c   : > { %s748_s10 = scalar_lea.vmem %s974_s25, 128  ;;  %p756_p2 = scmp.lt.s32.totalorder %s974_s25, %s974_s25 }
  0x1d   : > { %p749_p9 = scmp.ne.s32.totalorder %s974_s25, %s748_s10  ;;  %p757_p12 = scmp.lt.s32.totalorder %s748_s10, %s748_s10 }
  0x1f   : > { %p751_p10 = pnand %p749_p9, %p737_p13  ;;  %p758_p0 = por %p757_p12, %p756_p2 }
  0x21   : > { %p752_p1 = pneg %p751_p10 }
  0x23   : > { %p759_p6 = pnand %p758_p0, %p752_p1 }
  0x25   : > { %762 = shalt.err (!%p759_p6)
}
  0x26   : > { %s895_s11 = smov 64   ;;  %s896_s12 = smov 4  }
  0x27   : > { %664 = dma.hbm_to_vmem [thread:$0]  (!%p981_p11), %s1186_s1, 128, %s974_s25, [#allocation7], %s895_s11, %s895_s11, %s896_s12  }
  0x28   : > { %s763_s27 = scalar_lea.hbm %s1187_s2, 256 }
  0x29   : > { %p764_p1 = scmp.ne.s32.totalorder %s1187_s2, %s763_s27  ;;  %p770_p10 = scmp.lt.u32.totalorder %s763_s27, %s1187_s2 }
  0x2b   : > { %p766_p2 = pnand %p764_p1, %p737_p13 }
  0x2d   : > { %p767_p6 = pneg %p766_p2 }
  0x2f   : > { %p772_p3 = pnand %p770_p10, %p767_p6 }
  0x31   : > { %775 = shalt.err (!%p772_p3)
}
  0x32   : > { %s776_s25 = scalar_lea.vmem %s985_s28, 256  ;;  %p784_p12 = scmp.lt.s32.totalorder %s985_s28, %s985_s28 }
  0x33   : > { %p777_p5 = scmp.ne.s32.totalorder %s985_s28, %s776_s25  ;;  %p785_p0 = scmp.lt.s32.totalorder %s776_s25, %s776_s25 }
  0x35   : > { %p779_p7 = pnand %p777_p5, %p737_p13  ;;  %p786_p1 = por %p785_p0, %p784_p12 }
  0x37   : > { %p780_p9 = pneg %p779_p7 }
  0x39   : > { %p787_p2 = pnand %p786_p1, %p780_p9 }
  0x3b   : > { %790 = shalt.err (!%p787_p2)
}
  0x3c   : > { %667 = dma.hbm_to_vmem [thread:$0]  (!%p981_p11), %s1187_s2, 256, %s985_s28, [#allocation7], %s895_s11, %s895_s11, %s896_s12  }
  0x3d   : > { %s1046_s26 = sadd.s32 1, %s891_s18   ;;  %s28_s9 = sadd.s32 1, %s887_s17 }
  0x3e   : > { %s25_s10 = ssub.s32 %s891_s18, %s1046_s26  ;;  %p35_p13 = scmp.ne.s32.totalorder %s887_s17, %s883_s16 }
  0x3f   : > { %p26_p6 = scmp.eq.s32.totalorder %s25_s10, 0  ;;  %p36_p10 = scmp.eq.s32.totalorder %s891_s18, 0 }
  0x40   : > { %p1197_p3 = scmp.eq.s32.totalorder %s951_s19, 1  ;;  %p678_p7 = scmp.lt.s32.totalorder %s891_s18, 2 }
  0x41   : > { %s1062_s14 = scalar_select %p26_p6, %s887_s17, %s28_s9  }
  0x42   : > { %p1056_p5 = por %p1197_p3, %p35_p13  ;;  %p37_p9 = por %p36_p10, %p35_p13 }
  0x43   : > { %s183_s20 = sand.u32 1, %s887_s17   ;;  %s614_s28 = sshll.u32 %s891_s18, 9 }
  0x44   : > { %s1198_s13 = scalar_select %p1056_p5, 1, 0 }
  0x45   : > { %s584_s24 = sshll.u32 %s183_s20, 5  ;;  %s1069_s30 = scalar_lea.hbm %s1185_s0, %s614_s28 }
  0x46   : > { %s187_s5 = scalar_lea.vmem [#allocation3], %s584_s24  ;;  %p1073_p11 = pnand %p678_p7, %p37_p9 }
  0x47   : > { %s195_s6 = sshll.u32 %s187_s5, 4  ;;  %s1077_s7 = scalar_lea.sflag [#allocation4], %s183_s20  ;;  %s1071_s6 = int_to_ptr.vmem [resolvable:$true] %s195_s6 }
  0x48   : > { %s791_s8 = scalar_lea.hbm %s1069_s30, 512  ;;  %p793_p0 = pneg %p1073_p11 }
  0x49   : > { %p792_p12 = scmp.ne.s32.totalorder %s1069_s30, %s791_s8  ;;  %s796_s24 = scalar_lea.hbm %s1185_s0, 1024 }
  0x4a   : > { %p797_p13 = scmp.lt.u32.totalorder %s1069_s30, %s1185_s0  ;;  %p798_p6 = scmp.lt.u32.totalorder %s796_s24, %s791_s8 }
  0x4b   : > { %p794_p1 = pnand %p793_p0, %p792_p12  ;;  %p800_p3 = scmp.lt.u32.totalorder %s791_s8, %s1069_s30 }
  0x4c   : > { %p799_p10 = por %p798_p6, %p797_p13 }
  0x4d   : > { %p795_p2 = pneg %p794_p1 }
  0x4e   : > { %p801_p7 = por %p800_p3, %p799_p10 }
  0x50   : > { %p802_p9 = pnand %p801_p7, %p795_p2 }
  0x52   : > { %805 = shalt.err (!%p802_p9)
}
  0x53   : > { %s806_s20 = scalar_lea.vmem %s1071_s6, 512  ;;  %s897_s29 = smov [#allocation3]  }
  0x54   : > { %p807_p12 = scmp.ne.s32.totalorder %s1071_s6, %s806_s20  ;;  %s811_s5 = sshll.u32 %s897_s29, 4  ;;  %s812_s5 = int_to_ptr.vmem [resolvable:$false] %s811_s5 }
  0x55   : > { %s813_s9 = scalar_lea.vmem %s812_s5, 1024  ;;  %p814_p4 = scmp.lt.s32.totalorder %s1071_s6, %s812_s5 }
  0x56   : > { %p809_p1 = pnand %p807_p12, %p793_p0  ;;  %p815_p13 = scmp.lt.s32.totalorder %s813_s9, %s806_s20 }
  0x58   : > { %p810_p5 = pneg %p809_p1  ;;  %p816_p6 = por %p815_p13, %p814_p4 }
  0x5a   : > { %p817_p10 = pnand %p816_p6, %p810_p5 }
  0x5c   : > { %820 = shalt.err (!%p817_p10)
}
  0x5d   : > { %671 = dma.hbm_to_vmem [thread:$0]  (!%p1073_p11), %s1069_s30, 512, %s1071_s6, %s1077_s7, %s895_s11, %s895_s11, %s896_s12  }
  0x5e   : > { %207 = sbr.rel (%p970_p8) target bundleno = 716 (0x2cc), region = 36  ;;  %s1111_s8 = sand.u32 (!%p970_p8), 1, %s883_s16  }
  0x5f   : > { %s589_s10 = sshll.u32 (!%p970_p8), %s1111_s8, 5  ;;  %s210_s24 = scalar_lea.sflag (!%p970_p8), [#allocation4], %s1111_s8 }
  0x60   : > { %s213_s28 = scalar_lea.vmem (!%p970_p8), [#allocation3], %s589_s10  ;;  %p1200_p4 = scmp.ne.s32.totalorder (!%p970_p8), %s1193_s21, 0 }
  0x65   : > { %866 = dma.done.wait (%p1200_p4), %s210_s24, 512  }
  0x66   : > { %868 = vsyncadd (%p1200_p4), %s210_s24, 4294966784  ;;  %p1201_p5 = scmp.eq.s32.totalorder %s951_s19, 0 }
  0x68   : > { %870 = dma.done.wait (%p1201_p5), [#allocation7], 384   ;;  %p1202_p11 = pmov %p1201_p5 }
  0x69   : > { %v724_v0 = vld [vmem:[#allocation8] sm:$0xff]   ;;  %v725_v1 = vld [vmem:[#allocation8 + $0x8] sm:$0xff]   ;;  %vm292_vm0 = vcmask 261120   ;;  %v726_v2 = vld [vmem:[%s213_s28] sm:$0xff]   ;;  %v898_v11 = vmov 0.0   ;;  %s899_s21 = smov 32  }
  0x6a   : > { %872 = vsyncadd (%p1202_p11), [#allocation7], 4294966912  ;;  %631 = vmatprep.subr.bf16.mxu0 %v724_v0  ;;  %635 = vmatprep.mubr.msk.bf16.mxu0 %vm292_vm0, %v726_v2  ;;  %v727_v3 = vld [vmem:[%s213_s28 + $0x8] sm:$0xff]   ;;  %v728_v4 = vld [vmem:[%s213_s28 + $0x10] sm:$0xff]   ;;  %vm900_vm1 = vmmov 0   ;;  %s901_s23 = smov 96  }
  0x6b   : > { %632 = vmatpush3.bf16.msra.mxu0 %v724_v0  ;;  %v729_v5 = vld [vmem:[%s213_s28 + $0x18] sm:$0xff]   ;;  %643 = vmatprep.subr.bf16.mxu1 %v898_v11  ;;  %s902_s11 = smov 64   ;;  %vm377_vm2 = vcmask 523520   ;;  %vm384_vm3 = vcmask 785920   ;;  %vm391_vm4 = vcmask 1048320   ;;  %v730_v23 = vld [vmem:[#allocation6] sm:$0xff]  }
  0x6c   : > { %633 = vmatprep.subr.bf16.mxu0 %v725_v1  ;;  %645 = vmatprep.mubr.msk.bf16.mxu1 %vm900_vm1, %v898_v11  ;;  %vm408_vm5 = vcmask 130048   ;;  %v603_v24 = vld [vmem:[%s1188_s3] ss:$0 sm:$0xff]  ;;  %s592_s6 = sshll.u32 %s1111_s8, 3  ;;  %s617_s25 = sshll.u32 %s951_s19, 7 }
  0x6d   : > { %s245_s7 = scalar_lea.vmem [#allocation9], %s592_s6  ;;  %s1137_s5 = scalar_lea.hbm %s1189_s4, %s617_s25 }
  0x6e   : > { %s487_s27 = sshll.u32 %s245_s7, 4  ;;  %s474_s9 = scalar_lea.sflag [#allocation5], %s1111_s8  ;;  %s1139_s27 = int_to_ptr.vmem [resolvable:$true] %s487_s27 }
  0x6f   : > { %634 = vmatpush3.bf16.msra.mxu0 %v725_v1  ;;  %s821_s10 = scalar_lea.vmem %s1139_s27, 128  ;;  %p1203_p0 = scmp.ne.s32.totalorder %s1198_s13, 0 }
  0x70   : > { %p822_p8 = scmp.ne.s32.totalorder %s1139_s27, %s821_s10  ;;  %s903_s19 = smov [#allocation9]  }
  0x71   : > { %s825_s24 = sshll.u32 %s903_s19, 4  ;;  %s826_s24 = int_to_ptr.vmem [resolvable:$false] %s825_s24 }
  0x72   : > { %636 = vmatmul.mubr.msk.bf16.vlgmr.msra.gmra.mrb[0].mxu0 %vm292_vm0, %v727_v3  ;;  %p823_p2 = pnand %p822_p8, %p1203_p0  ;;  %s827_s28 = scalar_lea.vmem %s826_s24, 256 }
  0x73   : > { %639 = vmatprep.mubr.msk.bf16.mxu0 %vm292_vm0, %v728_v4  ;;  %p828_p7 = scmp.lt.s32.totalorder %s1139_s27, %s826_s24  ;;  %p829_p9 = scmp.lt.s32.totalorder %s827_s28, %s821_s10 }
  0x74   : > { %p824_p3 = pneg %p823_p2 }
  0x75   : > { %p830_p12 = por %p829_p9, %p828_p7 }
  0x77   : > { %p831_p1 = pnand %p830_p12, %p824_p3 }
  0x7a   : > { %640 = vmatmul.mubr.msk.bf16.gmra.mrb[4].mxu0 %vm292_vm0, %v729_v5 }
 0x145   : > { %v637_v6 = vpop.f32.mrb[0].mxu0 }
 0x146   : > { %v339_v7 = vpop.f32.mrb[1].mxu0 }
 0x147   : > { %v638_v8 = vpop.f32.mrb[2].mxu0 }
 0x148   : > { %v372_v9 = vpack.c.bf16 %v638_v8, %v637_v6  ;;  %v342_v10 = vpop.f32.mrb[3].mxu0 }
 0x149   : > { %v370_v12 = vpack.c.bf16 %v342_v10, %v339_v7 }
 0x14a   : > { %374 = vrot.lane.b32.xlu0 %v372_v9, %s899_s21 }
 0x14b   : > { %371 = vst.msk [vmem:[#allocation2] sm:$0xff] %vm292_vm0, %v370_v12 }
 0x14d   : > { %v641_v13 = vpop.f32.mrb[4].mxu0 }
 0x14e   : > { %v355_v14 = vpop.f32.mrb[5].mxu0 }
 0x14f   : > { %v642_v15 = vpop.f32.mrb[6].mxu0 }
 0x150   : > { %v386_v16 = vpack.c.bf16 %v642_v15, %v641_v13  ;;  %v358_v17 = vpop.f32.mrb[7].mxu0 }
 0x151   : > { %v379_v18 = vpack.c.bf16 %v358_v17, %v355_v14 }
 0x152   : > { %388 = vrot.lane.b32.xlu1 %v386_v16, %s901_s23 }
 0x153   : > { %381 = vrot.lane.b32.xlu0 %v379_v18, %s902_s11 }
 0x1bc   : > { %v375_v19 = vpop.permute.xlu0 %374 }
 0x1bd   : > { %378 = vst.msk [vmem:[#allocation2] sm:$0xff] %vm377_vm2, %v375_v19 }
 0x1c4   : > { %v389_v21 = vpop.permute.xlu1 %388 }
 0x1c5   : > { %v382_v20 = vpop.permute.xlu0 %381 }
 0x1c6   : > { %385 = vst.msk [vmem:[#allocation2] sm:$0xff] %vm384_vm3, %v382_v20 }
 0x1c7   : > { %392 = vst.msk [vmem:[#allocation2] sm:$0xff] %vm391_vm4, %v389_v21 }
 0x1ce   : > { %v393_v22 = vld [vmem:[#allocation2] sm:$0xff] }
 0x1cf   : > { %644 = vmatpush3.bf16.msra.mxu1 %v393_v22 }
 0x1d2   : > { %646 = vmatmul.mubr.msk.bf16.vlgmr.msra.gmra.mrb[0].mxu1 %vm408_vm5, %v730_v23 }
 0x2a5   : > { %v446_v25 = vpop.f32.mrb[0].mxu1 }
 0x2a6   : > { %v447_v26 = vadd.f32 %v603_v24, %v446_v25  ;;  %v647_v27 = vpop.f32.mrb[1].mxu1 }
 0x2a7   : > { %v449_v28 = vpop.f32.mrb[2].mxu1 }
 0x2a8   : > { %v455_v29 = vmul.f32 0.70710677, %v447_v26  ;;  %v450_v30 = vadd.f32 %v603_v24, %v449_v28  ;;  %v648_v31 = vpop.f32.mrb[3].mxu1  ;;  %v453_v36 = vmul.f32 0.5, %v447_v26 }
 0x2aa   : > { %731 = verf.f32 %v455_v29  ;;  %v456_v32 = vmul.f32 0.70710677, %v450_v30  ;;  %v454_v37 = vmul.f32 0.5, %v450_v30 }
 0x2ac   : > { %733 = verf.f32 %v456_v32 }
 0x2b4   : > { %v732_v33 = vpop.eup %731 }
 0x2b5   : > { %v459_v34 = vadd.f32 1.0, %v732_v33 }
 0x2b6   : > { %v734_v35 = vpop.eup %733 }
 0x2b7   : > { %v460_v38 = vadd.f32 1.0, %v734_v35  ;;  %v461_v39 = vmul.f32 %v459_v34, %v453_v36 }
 0x2b9   : > { %v462_v40 = vmul.f32 %v460_v38, %v454_v37 }
 0x2bb   : > { %v621_v41 = vpack.c.bf16 %v462_v40, %v461_v39 }
 0x2bd   : > { %622 = vst [vmem:[%s245_s7] sm:$0xff] %v621_v41  }
 0x2be   : > { %834 = shalt.err (!%p831_p1)
}
 0x2bf   : > { %s835_s21 = scalar_lea.hbm %s1137_s5, 128  ;;  %s839_s30 = scalar_lea.hbm %s1189_s4, 256 }
 0x2c0   : > { %p836_p13 = scmp.ne.s32.totalorder %s1137_s5, %s835_s21  ;;  %p840_p4 = scmp.lt.u32.totalorder %s1137_s5, %s1189_s4 }
 0x2c1   : > { %p841_p5 = scmp.lt.u32.totalorder %s839_s30, %s835_s21  ;;  %p843_p8 = scmp.lt.u32.totalorder %s835_s21, %s1137_s5 }
 0x2c2   : > { %p837_p6 = pnand %p836_p13, %p1203_p0 }
 0x2c3   : > { %p842_p11 = por %p841_p5, %p840_p4 }
 0x2c4   : > { %p838_p10 = pneg %p837_p6 }
 0x2c5   : > { %p844_p2 = por %p843_p8, %p842_p11 }
 0x2c7   : > { %p845_p3 = pnand %p844_p2, %p838_p10 }
 0x2c9   : > { %848 = shalt.err (!%p845_p3)
}
 0x2ca   : > { %s904_s7 = smov 4  }
 0x2cb   : > { %659 = dma.vmem_to_hbm [thread:$0]  (%p1203_p0), %s1139_s27, 128, %s1137_s5, %s474_s9, %s902_s11, %s902_s11, %s904_s7  }
 0x2cc PF: > { %s502_s20 = sand.u32 1, %s879_s15   ;;  %p1204_p7 = scmp.ne.s32.totalorder %s1194_s22, 0 }
 0x2cd   : > { %p1205_p9 = scmp.ge.s32.totalorder %s891_s18, 2  ;;  %s503_s29 = scalar_lea.sflag [#allocation5], %s502_s20 }
 0x2cf   : > { %p673_p12 = pnand %p1205_p9, %p1204_p7 }
 0x2d1   : > { %874 = dma.done.wait (!%p673_p12), %s503_s29, 128  }
 0x2d2   : > { %876 = vsyncadd (!%p673_p12), %s503_s29, 4294967168  ;;  %p18_p1 = scmp.ge.s32.totalorder %s1046_s26, 4   ;;  %s1206_s15 = smov %s883_s16 }
 0x2d3   : > { %s1207_s16 = smov %s887_s17  ;;  %s1208_s17 = smov %s1062_s14 }
 0x2d4   : > { %s1209_s18 = smov %s1046_s26  ;;  %20 = sbr.rel (!%p18_p1) target bundleno = 6 (0x6), region = 89 }
 0x2db   :  { %508 = vsyncpa [#allocation4], 1 }
 0x2dc   :  { %510 = vsyncpa [#allocation4 + $0x1], 1 }
 0x2dd   :  { %511 = vsyncpa [#allocation7], 1 }
 0x2de   :  { %512 = vsyncpa [#allocation5], 1 }
 0x2df   :  { %514 = vsyncpa [#allocation5 + $0x1], 1 }

// kernel: tpu_custom_call.1
= control target key start
LH: loop header
LB: loop body
LE: loop exit
PB: predicated region body
PF: predicated region fallthrough
CT: control target
= control target key end

     0   :  { %9 = vsyncpa [#allocation3], 0  ;;  %s1184_s0 = inlined_call_operand.hbm [shape: bf16[8,16,32], index: 0, kind: input, shape index: {}]   ;;  %s1185_s1 = inlined_call_operand.hbm [shape: bf16[16,16], index: 1, kind: input, shape index: {}]   ;;  %s1186_s2 = inlined_call_operand.hbm [shape: bf16[32,32], index: 2, kind: input, shape index: {}]   ;;  %s1187_s3 = inlined_call_operand.vmem [shape: f32[1,128], index: 3, kind: input, shape index: {}]   ;;  %s1188_s4 = inlined_call_operand.hbm [shape: bf16[2,16,128], index: 4, kind: output, shape index: {}]  }
   0x1   :  { %11 = vsyncpa [#allocation3 + $0x1], 0 }
   0x2   :  { %12 = vsyncpa [#allocation6], 0 }
   0x3   :  { %13 = vsyncpa [#allocation4], 0 }
   0x4   :  { %15 = vsyncpa [#allocation4 + $0x1], 0  ;;  %s929_s15 = smov 0   ;;  %s931_s16 = smov 0  }
   0x5   :  { %s933_s17 = smov 0   ;;  %s935_s18 = smov 0  }
   0x6 LB: > { %s950_s19 = sadd.s32 4294967295, %s890_s18   ;;  %s578_s20 = sadd.s32 4294967294, %s890_s18   ;;  %s890_s18 = sphi %s935_s18, %s1208_s18   ;;  %s886_s17 = sphi %s933_s17, %s1207_s17   ;;  %s882_s16 = sphi %s931_s16, %s1206_s16   ;;  %s878_s15 = sphi %s929_s15, %s1205_s15  }
   0x7   : > { %p41_p0 = scmp.ne.s32.totalorder %s882_s16, %s878_s15  ;;  %p1189_p1 = scmp.eq.s32.totalorder %s950_s19, 0 }
   0x8   : > { %p134_p3 = scmp.eq.s32.totalorder %s578_s20, 1  ;;  %p579_p5 = scmp.ge.s32.totalorder %s890_s18, 1 }
   0x9   : > { %p959_p4 = por %p1189_p1, %p41_p0  ;;  %p141_p7 = scmp.lt.s32.totalorder %s890_s18, 3 }
   0xa   : > { %p964_p6 = por %p134_p3, %p41_p0  ;;  %s892_s24 = smov [#allocation5]  }
   0xb   : > { %s1192_s21 = scalar_select %p959_p4, 1, 0 }
   0xc   : > { %s1193_s22 = scalar_select %p964_p6, 1, 0 }
   0xd   : > { %p969_p8 = pnand %p579_p5, %p141_p7  ;;  %s153_s25 = sshll.u32 %s892_s24, 4  ;;  %s973_s25 = int_to_ptr.vmem [resolvable:$true] %s153_s25 }
   0xe   : > { %s893_s27 = smov [#allocation7]   ;;  %s734_s5 = scalar_lea.hbm %s1185_s1, 128 }
   0xf   : > { %p660_p9 = pneg %p969_p8  ;;  %s166_s28 = sshll.u32 %s893_s27, 4  ;;  %s984_s28 = int_to_ptr.vmem [resolvable:$true] %s166_s28 }
  0x10   : > { %p735_p12 = scmp.ne.s32.totalorder %s1185_s1, %s734_s5  ;;  %p741_p5 = scmp.lt.u32.totalorder %s734_s5, %s1185_s1 }
  0x11   : > { %p980_p11 = pnand %p660_p9, %p1189_p1 }
  0x13   : > { %p736_p13 = pneg %p980_p11 }
  0x15   : > { %p737_p0 = pnand %p736_p13, %p735_p12 }
  0x17   : > { %p738_p3 = pneg %p737_p0 }
  0x19   : > { %p743_p7 = pnand %p741_p5, %p738_p3 }
  0x1b   : > { %746 = shalt.err (!%p743_p7)
}
  0x1c   : > { %s747_s10 = scalar_lea.vmem %s973_s25, 128  ;;  %p755_p2 = scmp.lt.s32.totalorder %s973_s25, %s973_s25 }
  0x1d   : > { %p748_p9 = scmp.ne.s32.totalorder %s973_s25, %s747_s10  ;;  %p756_p12 = scmp.lt.s32.totalorder %s747_s10, %s747_s10 }
  0x1f   : > { %p750_p10 = pnand %p748_p9, %p736_p13  ;;  %p757_p0 = por %p756_p12, %p755_p2 }
  0x21   : > { %p751_p1 = pneg %p750_p10 }
  0x23   : > { %p758_p6 = pnand %p757_p0, %p751_p1 }
  0x25   : > { %761 = shalt.err (!%p758_p6)
}
  0x26   : > { %s894_s11 = smov 64   ;;  %s895_s12 = smov 4  }
  0x27   : > { %663 = dma.hbm_to_vmem [thread:$0]  (!%p980_p11), %s1185_s1, 128, %s973_s25, [#allocation6], %s894_s11, %s894_s11, %s895_s12  }
  0x28   : > { %s762_s27 = scalar_lea.hbm %s1186_s2, 256 }
  0x29   : > { %p763_p1 = scmp.ne.s32.totalorder %s1186_s2, %s762_s27  ;;  %p769_p10 = scmp.lt.u32.totalorder %s762_s27, %s1186_s2 }
  0x2b   : > { %p765_p2 = pnand %p763_p1, %p736_p13 }
  0x2d   : > { %p766_p6 = pneg %p765_p2 }
  0x2f   : > { %p771_p3 = pnand %p769_p10, %p766_p6 }
  0x31   : > { %774 = shalt.err (!%p771_p3)
}
  0x32   : > { %s775_s25 = scalar_lea.vmem %s984_s28, 256  ;;  %p783_p12 = scmp.lt.s32.totalorder %s984_s28, %s984_s28 }
  0x33   : > { %p776_p5 = scmp.ne.s32.totalorder %s984_s28, %s775_s25  ;;  %p784_p0 = scmp.lt.s32.totalorder %s775_s25, %s775_s25 }
  0x35   : > { %p778_p7 = pnand %p776_p5, %p736_p13  ;;  %p785_p1 = por %p784_p0, %p783_p12 }
  0x37   : > { %p779_p9 = pneg %p778_p7 }
  0x39   : > { %p786_p2 = pnand %p785_p1, %p779_p9 }
  0x3b   : > { %789 = shalt.err (!%p786_p2)
}
  0x3c   : > { %666 = dma.hbm_to_vmem [thread:$0]  (!%p980_p11), %s1186_s2, 256, %s984_s28, [#allocation6], %s894_s11, %s894_s11, %s895_s12  }
  0x3d   : > { %s1045_s26 = sadd.s32 1, %s890_s18   ;;  %s28_s9 = sadd.s32 1, %s886_s17 }
  0x3e   : > { %s25_s10 = ssub.s32 %s890_s18, %s1045_s26  ;;  %p35_p13 = scmp.ne.s32.totalorder %s886_s17, %s882_s16 }
  0x3f   : > { %p26_p6 = scmp.eq.s32.totalorder %s25_s10, 0  ;;  %p36_p10 = scmp.eq.s32.totalorder %s890_s18, 0 }
  0x40   : > { %p1196_p3 = scmp.eq.s32.totalorder %s950_s19, 1  ;;  %p677_p7 = scmp.lt.s32.totalorder %s890_s18, 2 }
  0x41   : > { %s1061_s14 = scalar_select %p26_p6, %s886_s17, %s28_s9  }
  0x42   : > { %p1055_p5 = por %p1196_p3, %p35_p13  ;;  %p37_p9 = por %p36_p10, %p35_p13 }
  0x43   : > { %s183_s20 = sand.u32 1, %s886_s17   ;;  %s613_s28 = sshll.u32 %s890_s18, 9 }
  0x44   : > { %s1197_s13 = scalar_select %p1055_p5, 1, 0 }
  0x45   : > { %s583_s24 = sshll.u32 %s183_s20, 5  ;;  %s1068_s30 = scalar_lea.hbm %s1184_s0, %s613_s28 }
  0x46   : > { %s187_s5 = scalar_lea.vmem [#allocation2], %s583_s24  ;;  %p1072_p11 = pnand %p677_p7, %p37_p9 }
  0x47   : > { %s195_s6 = sshll.u32 %s187_s5, 4  ;;  %s1076_s7 = scalar_lea.sflag [#allocation3], %s183_s20  ;;  %s1070_s6 = int_to_ptr.vmem [resolvable:$true] %s195_s6 }
  0x48   : > { %s790_s8 = scalar_lea.hbm %s1068_s30, 512  ;;  %p792_p0 = pneg %p1072_p11 }
  0x49   : > { %p791_p12 = scmp.ne.s32.totalorder %s1068_s30, %s790_s8  ;;  %s795_s24 = scalar_lea.hbm %s1184_s0, 1024 }
  0x4a   : > { %p796_p13 = scmp.lt.u32.totalorder %s1068_s30, %s1184_s0  ;;  %p797_p6 = scmp.lt.u32.totalorder %s795_s24, %s790_s8 }
  0x4b   : > { %p793_p1 = pnand %p792_p0, %p791_p12  ;;  %p799_p3 = scmp.lt.u32.totalorder %s790_s8, %s1068_s30 }
  0x4c   : > { %p798_p10 = por %p797_p6, %p796_p13 }
  0x4d   : > { %p794_p2 = pneg %p793_p1 }
  0x4e   : > { %p800_p7 = por %p799_p3, %p798_p10 }
  0x50   : > { %p801_p9 = pnand %p800_p7, %p794_p2 }
  0x52   : > { %804 = shalt.err (!%p801_p9)
}
  0x53   : > { %s805_s20 = scalar_lea.vmem %s1070_s6, 512  ;;  %s896_s29 = smov [#allocation2]  }
  0x54   : > { %p806_p12 = scmp.ne.s32.totalorder %s1070_s6, %s805_s20  ;;  %s810_s5 = sshll.u32 %s896_s29, 4  ;;  %s811_s5 = int_to_ptr.vmem [resolvable:$false] %s810_s5 }
  0x55   : > { %s812_s9 = scalar_lea.vmem %s811_s5, 1024  ;;  %p813_p4 = scmp.lt.s32.totalorder %s1070_s6, %s811_s5 }
  0x56   : > { %p808_p1 = pnand %p806_p12, %p792_p0  ;;  %p814_p13 = scmp.lt.s32.totalorder %s812_s9, %s805_s20 }
  0x58   : > { %p809_p5 = pneg %p808_p1  ;;  %p815_p6 = por %p814_p13, %p813_p4 }
  0x5a   : > { %p816_p10 = pnand %p815_p6, %p809_p5 }
  0x5c   : > { %819 = shalt.err (!%p816_p10)
}
  0x5d   : > { %670 = dma.hbm_to_vmem [thread:$0]  (!%p1072_p11), %s1068_s30, 512, %s1070_s6, %s1076_s7, %s894_s11, %s894_s11, %s895_s12  }
  0x5e   : > { %207 = sbr.rel (%p969_p8) target bundleno = 709 (0x2c5), region = 36  ;;  %s1110_s8 = sand.u32 (!%p969_p8), 1, %s882_s16  }
  0x5f   : > { %s588_s10 = sshll.u32 (!%p969_p8), %s1110_s8, 5  ;;  %s210_s24 = scalar_lea.sflag (!%p969_p8), [#allocation3], %s1110_s8 }
  0x60   : > { %s213_s28 = scalar_lea.vmem (!%p969_p8), [#allocation2], %s588_s10  ;;  %p1199_p4 = scmp.ne.s32.totalorder (!%p969_p8), %s1192_s21, 0 }
  0x65   : > { %865 = dma.done.wait (%p1199_p4), %s210_s24, 512  }
  0x66   : > { %867 = vsyncadd (%p1199_p4), %s210_s24, 4294966784  ;;  %p1200_p5 = scmp.eq.s32.totalorder %s950_s19, 0 }
  0x68   : > { %869 = dma.done.wait (%p1200_p5), [#allocation6], 384   ;;  %p1201_p11 = pmov %p1200_p5 }
  0x69   : > { %v723_v0 = vld [vmem:[#allocation7] sm:$0xff]   ;;  %v724_v1 = vld [vmem:[#allocation7 + $0x8] sm:$0xff]   ;;  %vm292_vm0 = vcmask 261120   ;;  %v725_v2 = vld [vmem:[%s213_s28] sm:$0xff]   ;;  %v897_v9 = vmov 0.0   ;;  %vm898_vm1 = vmmov 0  }
  0x6a   : > { %871 = vsyncadd (%p1201_p11), [#allocation6], 4294966912  ;;  %630 = vmatprep.subr.bf16.mxu0 %v723_v0  ;;  %634 = vmatprep.mubr.msk.bf16.mxu0 %vm292_vm0, %v725_v2  ;;  %v726_v3 = vld [vmem:[%s213_s28 + $0x8] sm:$0xff]   ;;  %v727_v4 = vld [vmem:[%s213_s28 + $0x10] sm:$0xff]   ;;  %s899_s21 = smov 32   ;;  %s900_s23 = smov 96  }
  0x6b   : > { %631 = vmatpush3.bf16.msra.mxu0 %v723_v0  ;;  %v728_v5 = vld [vmem:[%s213_s28 + $0x18] sm:$0xff]   ;;  %642 = vmatprep.subr.bf16.mxu1 %v897_v9  ;;  %s901_s11 = smov 64   ;;  %vm386_vm2 = vcmask 523264   ;;  %vm389_vm3 = vcmask 785408   ;;  %v729_v25 = vld [vmem:[#allocation5] sm:$0xff]   ;;  %vm407_vm4 = vcmask 130048  }
  0x6c   : > { %632 = vmatprep.subr.bf16.mxu0 %v724_v1  ;;  %644 = vmatprep.mubr.msk.bf16.mxu1 %vm898_vm1, %v897_v9  ;;  %v602_v26 = vld [vmem:[%s1187_s3] ss:$0 sm:$0xff]  ;;  %s591_s6 = sshll.u32 %s1110_s8, 3  ;;  %s616_s25 = sshll.u32 %s950_s19, 7 }
  0x6d   : > { %s245_s7 = scalar_lea.vmem [#allocation8], %s591_s6  ;;  %s1136_s5 = scalar_lea.hbm %s1188_s4, %s616_s25 }
  0x6e   : > { %s486_s27 = sshll.u32 %s245_s7, 4  ;;  %s473_s9 = scalar_lea.sflag [#allocation4], %s1110_s8  ;;  %s1138_s27 = int_to_ptr.vmem [resolvable:$true] %s486_s27 }
  0x6f   : > { %633 = vmatpush3.bf16.msra.mxu0 %v724_v1  ;;  %s820_s10 = scalar_lea.vmem %s1138_s27, 128  ;;  %p1202_p0 = scmp.ne.s32.totalorder %s1197_s13, 0 }
  0x70   : > { %p821_p8 = scmp.ne.s32.totalorder %s1138_s27, %s820_s10  ;;  %s902_s19 = smov [#allocation8]  }
  0x71   : > { %s824_s24 = sshll.u32 %s902_s19, 4  ;;  %s825_s24 = int_to_ptr.vmem [resolvable:$false] %s824_s24 }
  0x72   : > { %635 = vmatmul.mubr.msk.bf16.vlgmr.msra.gmra.mrb[0].mxu0 %vm292_vm0, %v726_v3  ;;  %p822_p2 = pnand %p821_p8, %p1202_p0  ;;  %s826_s28 = scalar_lea.vmem %s825_s24, 256 }
  0x73   : > { %638 = vmatprep.mubr.msk.bf16.mxu0 %vm292_vm0, %v727_v4  ;;  %p827_p7 = scmp.lt.s32.totalorder %s1138_s27, %s825_s24  ;;  %p828_p9 = scmp.lt.s32.totalorder %s826_s28, %s820_s10 }
  0x74   : > { %p823_p3 = pneg %p822_p2 }
  0x75   : > { %p829_p12 = por %p828_p9, %p827_p7 }
  0x77   : > { %p830_p1 = pnand %p829_p12, %p823_p3 }
  0x7a   : > { %639 = vmatmul.mubr.msk.bf16.gmra.mrb[4].mxu0 %vm292_vm0, %v728_v5 }
 0x145   : > { %v636_v6 = vpop.f32.mrb[0].mxu0 }
 0x146   : > { %v339_v7 = vpop.f32.mrb[1].mxu0 }
 0x147   : > { %v637_v8 = vpop.f32.mrb[2].mxu0 }
 0x148   : > { %v371_v10 = vpack.c.bf16 %v637_v8, %v636_v6  ;;  %v342_v11 = vpop.f32.mrb[3].mxu0 }
 0x149   : > { %v370_v12 = vpack.c.bf16 %v342_v11, %v339_v7 }
 0x14a   : > { %375 = vrot.lane.b32.xlu0 %v371_v10, %s899_s21 }
 0x14d   : > { %v640_v13 = vpop.f32.mrb[4].mxu0 }
 0x14e   : > { %v355_v14 = vpop.f32.mrb[5].mxu0 }
 0x14f   : > { %v641_v15 = vpop.f32.mrb[6].mxu0 }
 0x150   : > { %v373_v16 = vpack.c.bf16 %v641_v15, %v640_v13  ;;  %v358_v17 = vpop.f32.mrb[7].mxu0 }
 0x151   : > { %v372_v18 = vpack.c.bf16 %v358_v17, %v355_v14 }
 0x152   : > { %381 = vrot.lane.b32.xlu1 %v373_v16, %s900_s23 }
 0x153   : > { %378 = vrot.lane.b32.xlu0 %v372_v18, %s901_s11 }
 0x1bc   : > { %v376_v19 = vpop.permute.xlu0 %375 }
 0x1bd   : > { %v385_v20 = vsel %vm292_vm0, %v370_v12, %v376_v19 }
 0x1c4   : > { %v382_v22 = vpop.permute.xlu1 %381 }
 0x1c5   : > { %v379_v21 = vpop.permute.xlu0 %378 }
 0x1c6   : > { %v388_v23 = vsel %vm386_vm2, %v385_v20, %v379_v21 }
 0x1c7   : > { %v391_v24 = vsel %vm389_vm3, %v388_v23, %v382_v22 }
 0x1c8   : > { %643 = vmatpush3.bf16.msra.mxu1 %v391_v24 }
 0x1cb   : > { %645 = vmatmul.mubr.msk.bf16.vlgmr.msra.gmra.mrb[0].mxu1 %vm407_vm4, %v729_v25 }
 0x29e   : > { %v445_v27 = vpop.f32.mrb[0].mxu1 }
 0x29f   : > { %v446_v28 = vadd.f32 %v602_v26, %v445_v27  ;;  %v646_v29 = vpop.f32.mrb[1].mxu1 }
 0x2a0   : > { %v448_v30 = vpop.f32.mrb[2].mxu1 }
 0x2a1   : > { %v454_v31 = vmul.f32 0.70710677, %v446_v28  ;;  %v449_v32 = vadd.f32 %v602_v26, %v448_v30  ;;  %v647_v33 = vpop.f32.mrb[3].mxu1  ;;  %v452_v38 = vmul.f32 0.5, %v446_v28 }
 0x2a3   : > { %730 = verf.f32 %v454_v31  ;;  %v455_v34 = vmul.f32 0.70710677, %v449_v32  ;;  %v453_v39 = vmul.f32 0.5, %v449_v32 }
 0x2a5   : > { %732 = verf.f32 %v455_v34 }
 0x2ad   : > { %v731_v35 = vpop.eup %730 }
 0x2ae   : > { %v458_v36 = vadd.f32 1.0, %v731_v35 }
 0x2af   : > { %v733_v37 = vpop.eup %732 }
 0x2b0   : > { %v459_v40 = vadd.f32 1.0, %v733_v37  ;;  %v460_v41 = vmul.f32 %v458_v36, %v452_v38 }
 0x2b2   : > { %v461_v42 = vmul.f32 %v459_v40, %v453_v39 }
 0x2b4   : > { %v620_v43 = vpack.c.bf16 %v461_v42, %v460_v41 }
 0x2b6   : > { %621 = vst [vmem:[%s245_s7] sm:$0xff] %v620_v43  }
 0x2b7   : > { %833 = shalt.err (!%p830_p1)
}
 0x2b8   : > { %s834_s21 = scalar_lea.hbm %s1136_s5, 128  ;;  %s838_s30 = scalar_lea.hbm %s1188_s4, 256 }
 0x2b9   : > { %p835_p13 = scmp.ne.s32.totalorder %s1136_s5, %s834_s21  ;;  %p839_p4 = scmp.lt.u32.totalorder %s1136_s5, %s1188_s4 }
 0x2ba   : > { %p840_p5 = scmp.lt.u32.totalorder %s838_s30, %s834_s21  ;;  %p842_p8 = scmp.lt.u32.totalorder %s834_s21, %s1136_s5 }
 0x2bb   : > { %p836_p6 = pnand %p835_p13, %p1202_p0 }
 0x2bc   : > { %p841_p11 = por %p840_p5, %p839_p4 }
 0x2bd   : > { %p837_p10 = pneg %p836_p6 }
 0x2be   : > { %p843_p2 = por %p842_p8, %p841_p11 }
 0x2c0   : > { %p844_p3 = pnand %p843_p2, %p837_p10 }
 0x2c2   : > { %847 = shalt.err (!%p844_p3)
}
 0x2c3   : > { %s903_s7 = smov 4  }
 0x2c4   : > { %658 = dma.vmem_to_hbm [thread:$0]  (%p1202_p0), %s1138_s27, 128, %s1136_s5, %s473_s9, %s901_s11, %s901_s11, %s903_s7  }
 0x2c5 PF: > { %s501_s20 = sand.u32 1, %s878_s15   ;;  %p1203_p7 = scmp.ne.s32.totalorder %s1193_s22, 0 }
 0x2c6   : > { %p1204_p9 = scmp.ge.s32.totalorder %s890_s18, 2  ;;  %s502_s29 = scalar_lea.sflag [#allocation4], %s501_s20 }
 0x2c8   : > { %p672_p12 = pnand %p1204_p9, %p1203_p7 }
 0x2ca   : > { %873 = dma.done.wait (!%p672_p12), %s502_s29, 128  }
 0x2cb   : > { %875 = vsyncadd (!%p672_p12), %s502_s29, 4294967168  ;;  %p18_p1 = scmp.ge.s32.totalorder %s1045_s26, 4   ;;  %s1205_s15 = smov %s882_s16 }
 0x2cc   : > { %s1206_s16 = smov %s886_s17  ;;  %s1207_s17 = smov %s1061_s14 }
 0x2cd   : > { %s1208_s18 = smov %s1045_s26  ;;  %20 = sbr.rel (!%p18_p1) target bundleno = 6 (0x6), region = 89 }
 0x2d4   :  { %507 = vsyncpa [#allocation3], 1 }
 0x2d5   :  { %509 = vsyncpa [#allocation3 + $0x1], 1 }
 0x2d6   :  { %510 = vsyncpa [#allocation6], 1 }
 0x2d7   :  { %511 = vsyncpa [#allocation4], 1 }
 0x2d8   :  { %513 = vsyncpa [#allocation4 + $0x1], 1 }

</bundles_post_ra>
